<compile_context>
chip_gen: v6e
topology: v6e:2x2x1
jax: 0.10.0
libtpu: 0.0.40
codegen_flags: <defaults>
</compile_context>

<pallas_src>
import jax
import jax.numpy as jnp
from jax import lax
from jax.experimental import pallas as pl
from jax.experimental.pallas import tpu as pltpu

_EPS = 1e-5
# Double-buffered input + double-buffered output blocks must fit here.
# 40 MiB leaves headroom under v7x's 64 MiB physical VMEM (and is far below
# v5e/v6e's 128 MiB).
_VMEM_BLOCK_BUDGET = 40 * 1024 * 1024
_VMEM_LIMIT_BYTES = 48 * 1024 * 1024


def batchnorm_kernel(x_ref, gamma_ref, beta_ref, out_ref):
    # x_ref, out_ref: (B, c_tile, HW) f32   -- lane dim is HW
    # gamma_ref, beta_ref: (c_tile, 1) f32
    B, c_tile, _ = x_ref.shape
    HW = x_ref.shape[-1]
    count = jnp.float32(B * HW)

    zeros = jnp.zeros((c_tile, 1), jnp.float32)

    # ---- Pass 1: streaming per-channel sum / sum-of-squares over the batch.
    # One (c_tile, HW) slab live at a time; spatial reduction is a single
    # cross-lane (XLU) reduce per slab, batch reduction is the loop carry.
    def stats_body(b, carry):
        s1, s2 = carry
        xb = x_ref[b]                                         # (c_tile, HW)
        s1 = s1 + jnp.sum(xb, axis=-1, keepdims=True)
        s2 = s2 + jnp.sum(xb * xb, axis=-1, keepdims=True)
        return s1, s2

    s1, s2 = lax.fori_loop(0, B, stats_body, (zeros, zeros), unroll=True)

    mean = s1 / count                                         # (c_tile, 1)
    var = jnp.maximum(s2 / count - mean * mean, 0.0)          # biased, clamped
    inv = lax.rsqrt(var + _EPS)                               # EUP slot

    scale = gamma_ref[...] * inv                              # (c_tile, 1)
    shift = beta_ref[...] - mean * scale                      # (c_tile, 1)

    # ---- Pass 2: streaming normalize + affine, stores go straight to out_ref.
    def norm_body(b, carry):
        out_ref[b] = x_ref[b] * scale + shift
        return carry

    lax.fori_loop(0, B, norm_body, 0, unroll=True)


def _pick_c_tile(B, C, HW):
    """Largest sublane-aligned channel tile whose pipelined footprint fits VMEM."""
    bytes_per_channel = B * HW * 4                 # one channel's slab, f32
    # in + out blocks, each double-buffered by the pipeline -> 4 copies.
    footprint = lambda ct: 4 * ct * bytes_per_channel

    divisors = [d for d in range(1, C + 1) if C % d == 0]
    aligned = [d for d in divisors if d % 8 == 0]  # f32 sublane multiple
    for d in sorted(aligned, reverse=True):
        if footprint(d) <= _VMEM_BLOCK_BUDGET:
            return d
    if aligned:
        return min(aligned)                        # smallest legal tile
    # No divisor of C is a multiple of 8 (e.g. C < 8): the only (8,128)-legal
    # block is the full channel extent.
    return C


def batchnorm_pallas(x_nchw, gamma, beta):
    """x_nchw: (B, C, H, W) f32; gamma, beta: (C,) f32. Returns (B, C, H, W) f32."""
    B, C, H, W = x_nchw.shape
    HW = H * W
    x = x_nchw.astype(jnp.float32).reshape(B, C, HW)   # contiguous view
    g = gamma.reshape(C, 1).astype(jnp.float32)
    b = beta.reshape(C, 1).astype(jnp.float32)

    c_tile = _pick_c_tile(B, C, HW)
    num_tiles = C // c_tile

    out = pl.pallas_call(
        batchnorm_kernel,
        out_shape=jax.ShapeDtypeStruct((B, C, HW), jnp.float32),
        grid=(num_tiles,),
        in_specs=[
            pl.BlockSpec((B, c_tile, HW), lambda c: (0, c, 0)),
            pl.BlockSpec((c_tile, 1), lambda c: (c, 0)),
            pl.BlockSpec((c_tile, 1), lambda c: (c, 0)),
        ],
        out_specs=pl.BlockSpec((B, c_tile, HW), lambda c: (0, c, 0)),
        compiler_params=pltpu.CompilerParams(
            dimension_semantics=("parallel",),
            vmem_limit_bytes=_VMEM_LIMIT_BYTES,
        ),
        cost_estimate=pl.CostEstimate(
            flops=7 * B * C * HW,          # sums, squares, normalize+affine
            transcendentals=C,             # one rsqrt per channel
            bytes_accessed=2 * B * C * HW * 4 + 2 * C * 4,
        ),
    )(x, g, b)
    return out.reshape(B, C, H, W)


def batchnorm_reference(x, gamma, beta):
    """Pure-JAX reference of training-mode BatchNorm2d forward."""
    mean = jnp.mean(x, axis=(0, 2, 3), keepdims=True)
    var = jnp.mean((x - mean) ** 2, axis=(0, 2, 3), keepdims=True)
    xhat = (x - mean) * lax.rsqrt(var + _EPS)
    return xhat * gamma[None, :, None, None] + beta[None, :, None, None]


if __name__ == "__main__":
    B, C, H, W = 2, 4, 16, 16
    key = jax.random.PRNGKey(0)
    kx, kg, kb = jax.random.split(key, 3)

    x = jax.random.normal(kx, (B, C, H, W), jnp.float32)
    # PyTorch inits gamma=1, beta=0; randomize slightly to exercise the affine path.
    gamma = 1.0 + 0.1 * jax.random.normal(kg, (C,), jnp.float32)
    beta = 0.1 * jax.random.normal(kb, (C,), jnp.float32)

    out = batchnorm_pallas(x, gamma, beta)
    out = jax.block_until_ready(out)

    ref = batchnorm_reference(x, gamma, beta)
    assert out.shape == (B, C, H, W)
    max_err = jnp.max(jnp.abs(out - ref))
    assert jnp.allclose(out, ref, atol=1e-4, rtol=1e-4), f"max abs err = {max_err}"

    print("KERNEL_OK")
</pallas_src>

<mosaic_0001>
module attributes {stable_mosaic.version = 11 : i64} {
  func.func @batchnorm_kernel(%arg0: i32, %arg1: memref<2x4x256xf32, #tpu.memory_space<vmem>>, %arg2: memref<4x1xf32, #tpu.memory_space<vmem>>, %arg3: memref<4x1xf32, #tpu.memory_space<vmem>>, %arg4: memref<2x4x256xf32, #tpu.memory_space<vmem>>) attributes {dimension_semantics = [#tpu.dimension_semantics<parallel>], iteration_bounds = array<i64: 1>, scalar_prefetch = 0 : i64, scratch_operands = 0 : i64, tpu.core_type = #tpu.core_type<tc>, window_params = [{transform_indices = @transform_0, window_bounds = array<i64: 2, 4, 256>}, {transform_indices = @transform_1, window_bounds = array<i64: 4, 1>}, {transform_indices = @transform_2, window_bounds = array<i64: 4, 1>}, {transform_indices = @transform_3, window_bounds = array<i64: 2, 4, 256>}]} {
    %cst = arith.constant 0.000000e+00 : f32
    %0 = vector.broadcast %cst : f32 to vector<4x1xf32>
    %c0_i32 = arith.constant 0 : i32
    %1 = arith.index_cast %c0_i32 : i32 to index
    %c0 = arith.constant 0 : index
    %c0_0 = arith.constant 0 : index
    %2 = vector.load %arg1[%1, %c0, %c0_0] : memref<2x4x256xf32, #tpu.memory_space<vmem>>, vector<1x4x256xf32>
    %3 = vector.shape_cast %2 : vector<1x4x256xf32> to vector<4x256xf32>
    %cst_1 = arith.constant dense<0.000000e+00> : vector<4xf32>
    %4 = vector.multi_reduction <add>, %3, %cst_1 [1] : vector<4x256xf32> to vector<4xf32>
    %5 = vector.shape_cast %4 : vector<4xf32> to vector<4x1xf32>
    %6 = arith.addf %0, %5 : vector<4x1xf32>
    %7 = arith.mulf %3, %3 : vector<4x256xf32>
    %cst_2 = arith.constant dense<0.000000e+00> : vector<4xf32>
    %8 = vector.multi_reduction <add>, %7, %cst_2 [1] : vector<4x256xf32> to vector<4xf32>
    %9 = vector.shape_cast %8 : vector<4xf32> to vector<4x1xf32>
    %10 = arith.addf %0, %9 : vector<4x1xf32>
    %c1_i32 = arith.constant 1 : i32
    %11 = arith.index_cast %c1_i32 : i32 to index
    %c0_3 = arith.constant 0 : index
    %c0_4 = arith.constant 0 : index
    %12 = vector.load %arg1[%11, %c0_3, %c0_4] : memref<2x4x256xf32, #tpu.memory_space<vmem>>, vector<1x4x256xf32>
    %13 = vector.shape_cast %12 : vector<1x4x256xf32> to vector<4x256xf32>
    %cst_5 = arith.constant dense<0.000000e+00> : vector<4xf32>
    %14 = vector.multi_reduction <add>, %13, %cst_5 [1] : vector<4x256xf32> to vector<4xf32>
    %15 = vector.shape_cast %14 : vector<4xf32> to vector<4x1xf32>
    %16 = arith.addf %6, %15 : vector<4x1xf32>
    %17 = arith.mulf %13, %13 : vector<4x256xf32>
    %cst_6 = arith.constant dense<0.000000e+00> : vector<4xf32>
    %18 = vector.multi_reduction <add>, %17, %cst_6 [1] : vector<4x256xf32> to vector<4xf32>
    %19 = vector.shape_cast %18 : vector<4xf32> to vector<4x1xf32>
    %20 = arith.addf %10, %19 : vector<4x1xf32>
    %c2_i32 = arith.constant 2 : i32
    %cst_7 = arith.constant 5.120000e+02 : f32
    %21 = vector.broadcast %cst_7 : f32 to vector<4x1xf32>
    %22 = arith.divf %16, %21 : vector<4x1xf32>
    %cst_8 = arith.constant 5.120000e+02 : f32
    %23 = vector.broadcast %cst_8 : f32 to vector<4x1xf32>
    %24 = arith.divf %20, %23 : vector<4x1xf32>
    %25 = arith.mulf %22, %22 : vector<4x1xf32>
    %26 = arith.subf %24, %25 : vector<4x1xf32>
    %cst_9 = arith.constant 0.000000e+00 : f32
    %27 = vector.broadcast %cst_9 : f32 to vector<4x1xf32>
    %28 = arith.maximumf %26, %27 : vector<4x1xf32>
    %cst_10 = arith.constant 9.99999974E-6 : f32
    %29 = vector.broadcast %cst_10 : f32 to vector<4x1xf32>
    %30 = arith.addf %28, %29 : vector<4x1xf32>
    %31 = math.rsqrt %30 : vector<4x1xf32>
    %c0_11 = arith.constant 0 : index
    %c0_12 = arith.constant 0 : index
    %32 = vector.load %arg2[%c0_11, %c0_12] : memref<4x1xf32, #tpu.memory_space<vmem>>, vector<4x1xf32>
    %33 = arith.mulf %32, %31 : vector<4x1xf32>
    %c0_13 = arith.constant 0 : index
    %c0_14 = arith.constant 0 : index
    %34 = vector.load %arg3[%c0_13, %c0_14] : memref<4x1xf32, #tpu.memory_space<vmem>>, vector<4x1xf32>
    %35 = arith.mulf %22, %33 : vector<4x1xf32>
    %36 = arith.subf %34, %35 : vector<4x1xf32>
    %c0_i32_15 = arith.constant 0 : i32
    %37 = arith.index_cast %c0_i32_15 : i32 to index
    %c0_16 = arith.constant 0 : index
    %c0_17 = arith.constant 0 : index
    %38 = vector.load %arg1[%37, %c0_16, %c0_17] : memref<2x4x256xf32, #tpu.memory_space<vmem>>, vector<1x4x256xf32>
    %39 = vector.shape_cast %38 : vector<1x4x256xf32> to vector<4x256xf32>
    %40 = vector.broadcast %33 : vector<4x1xf32> to vector<4x256xf32>
    %41 = arith.mulf %39, %40 : vector<4x256xf32>
    %42 = vector.broadcast %36 : vector<4x1xf32> to vector<4x256xf32>
    %43 = arith.addf %41, %42 : vector<4x256xf32>
    %44 = arith.index_cast %c0_i32_15 : i32 to index
    %c0_18 = arith.constant 0 : index
    %c0_19 = arith.constant 0 : index
    %45 = vector.load %arg4[%44, %c0_18, %c0_19] : memref<2x4x256xf32, #tpu.memory_space<vmem>>, vector<1x4x256xf32>
    %46 = vector.shape_cast %45 : vector<1x4x256xf32> to vector<4x256xf32>
    %47 = vector.shape_cast %43 : vector<4x256xf32> to vector<1x4x256xf32>
    tpu.vector_store %arg4[%44, %c0_18, %c0_19], %47 {strides = array<i32>} : memref<2x4x256xf32, #tpu.memory_space<vmem>>, vector<1x4x256xf32>,
    %c1_i32_20 = arith.constant 1 : i32
    %48 = arith.index_cast %c1_i32_20 : i32 to index
    %c0_21 = arith.constant 0 : index
    %c0_22 = arith.constant 0 : index
    %49 = vector.load %arg1[%48, %c0_21, %c0_22] : memref<2x4x256xf32, #tpu.memory_space<vmem>>, vector<1x4x256xf32>
    %50 = vector.shape_cast %49 : vector<1x4x256xf32> to vector<4x256xf32>
    %51 = vector.broadcast %33 : vector<4x1xf32> to vector<4x256xf32>
    %52 = arith.mulf %50, %51 : vector<4x256xf32>
    %53 = vector.broadcast %36 : vector<4x1xf32> to vector<4x256xf32>
    %54 = arith.addf %52, %53 : vector<4x256xf32>
    %55 = arith.index_cast %c1_i32_20 : i32 to index
    %c0_23 = arith.constant 0 : index
    %c0_24 = arith.constant 0 : index
    %56 = vector.load %arg4[%55, %c0_23, %c0_24] : memref<2x4x256xf32, #tpu.memory_space<vmem>>, vector<1x4x256xf32>
    %57 = vector.shape_cast %56 : vector<1x4x256xf32> to vector<4x256xf32>
    %58 = vector.shape_cast %54 : vector<4x256xf32> to vector<1x4x256xf32>
    tpu.vector_store %arg4[%55, %c0_23, %c0_24], %58 {strides = array<i32>} : memref<2x4x256xf32, #tpu.memory_space<vmem>>, vector<1x4x256xf32>,
    %c2_i32_25 = arith.constant 2 : i32
    return
  }
  func.func @transform_0(%arg0: i32) -> (i32, i32, i32) {
    %c0_i32 = arith.constant 0 : i32
    %c0_i32_0 = arith.constant 0 : i32
    %c0_i32_1 = arith.constant 0 : i32
    return %c0_i32, %arg0, %c0_i32_0 : i32, i32, i32
  }
  func.func @transform_1(%arg0: i32) -> (i32, i32) {
    %c0_i32 = arith.constant 0 : i32
    %c0_i32_0 = arith.constant 0 : i32
    return %arg0, %c0_i32 : i32, i32
  }
  func.func @transform_2(%arg0: i32) -> (i32, i32) {
    %c0_i32 = arith.constant 0 : i32
    %c0_i32_0 = arith.constant 0 : i32
    return %arg0, %c0_i32 : i32, i32
  }
  func.func @transform_3(%arg0: i32) -> (i32, i32, i32) {
    %c0_i32 = arith.constant 0 : i32
    %c0_i32_0 = arith.constant 0 : i32
    %c0_i32_1 = arith.constant 0 : i32
    return %c0_i32, %arg0, %c0_i32_0 : i32, i32, i32
  }
}

</mosaic_0001>

<bundles_post_ra>
// kernel: tpu_custom_call.1
= control target key start
LH: loop header
LB: loop body
LE: loop exit
PB: predicated region body
PF: predicated region fallthrough
CT: control target
= control target key end

     0   :  { %8 = vsyncpa [#allocation3], 0  ;;  %s241_s0 = inlined_call_operand.hbm [shape: f32[2,4,256], index: 0, kind: input, shape index: {}]   ;;  %s242_s1 = inlined_call_operand.vmem [shape: f32[4,1], index: 1, kind: input, shape index: {}]   ;;  %s243_s2 = inlined_call_operand.vmem [shape: f32[4,1], index: 2, kind: input, shape index: {}]   ;;  %s244_s3 = inlined_call_operand.hbm [shape: f32[2,4,256], index: 3, kind: output, shape index: {}]  }
   0x1   :  { %9 = vsyncpa [#allocation4], 0  ;;  %s189_s12 = smov [#allocation2]  }
   0x2   :  { %s15_s13 = sshll.u32 %s189_s12, 4  ;;  %s16_s13 = int_to_ptr.vmem [resolvable:$true] %s15_s13 }
   0x3   :  { %s153_s14 = scalar_lea.vmem %s16_s13, 256  ;;  %p158_p1 = scmp.lt.s32.totalorder %s16_s13, %s16_s13 }
   0x4   :  { %p154_p0 = scmp.ne.s32.totalorder %s16_s13, %s153_s14  ;;  %p159_p2 = scmp.lt.s32.totalorder %s153_s14, %s153_s14 }
   0x6   :  { %p160_p3 = por %p159_p2, %p158_p1 }
   0x8   :  { %p161_p4 = pnand %p160_p3, %p154_p0 }
   0xa   :  { %164 = shalt.err (!%p161_p4)
}
   0xb   :  { %s190_s15 = smov 128   ;;  %s191_s16 = smov 8  }
   0xc   :  { %21 = dma.hbm_to_vmem [thread:$0]  %s241_s0, 256, %s16_s13, [#allocation3], %s190_s15, %s190_s15, %s191_s16  }
   0xd   :  { %185 = dma.done.wait [#allocation3], 256  }
   0xe   :  { %186 = vsyncadd [#allocation3], 4294967040  ;;  %vm33_vm0 = vcmask 1043456   ;;  %v29_v0 = vld [vmem:[#allocation2] sm:$0xff]  ;;  %v51_v1 = vld [vmem:[#allocation2 + $0x8] sm:$0xff]  ;;  %v192_v20 = vmov 0   ;;  %v91_v41 = vlaneseq }
   0xf   :  { %v31_v2 = vcombine.high %v29_v0, %v29_v0  ;;  %v34_v3 = vsel %vm33_vm0, %v29_v0, 0.0  ;;  %v40_v4 = vmul.f32 %v29_v0, %v29_v0  ;;  %v53_v5 = vcombine.high %v51_v1, %v51_v1  ;;  %139 = vset.pattern.permute.xlu0 %v192_v20  ;;  %140 = vset.pattern.permute.xlu1 %v192_v20  ;;  %v79_v33 = vld [vmem:[%s242_s1] sm:$0xf]  ;;  %s194_s1 = smov [#allocation5]  }
  0x10   :  { %v55_v6 = vsel %vm33_vm0, %v51_v1, 0.0  ;;  %v61_v7 = vmul.f32 %v51_v1, %v51_v1  ;;  %v81_v36 = vld [vmem:[%s243_s2] sm:$0xf]  ;;  %v193_v39 = vmov 839922192   ;;  %v92_v43 = vshrl.u32 %v91_v41, 7 }
  0x11   :  { %v35_v8 = vsel %vm33_vm0, %v31_v2, 0.0  ;;  %v42_v9 = vcombine.high %v40_v4, %v40_v4  ;;  %v44_v10 = vsel %vm33_vm0, %v40_v4, 0.0  ;;  %v56_v11 = vsel %vm33_vm0, %v53_v5, 0.0  ;;  %s121_s22 = sshll.u32 %s194_s1, 4  ;;  %s122_s22 = int_to_ptr.vmem [resolvable:$true] %s121_s22 }
  0x12   :  { %v36_v12 = vadd.f32 %v35_v8, %v34_v3  ;;  %v63_v13 = vcombine.high %v61_v7, %v61_v7  ;;  %v65_v15 = vsel %vm33_vm0, %v61_v7, 0.0  ;;  %v57_v17 = vadd.f32 %v56_v11, %v55_v6  ;;  %s165_s2 = scalar_lea.vmem %s122_s22, 256  ;;  %p170_p6 = scmp.lt.s32.totalorder %s122_s22, %s122_s22 }
  0x13   :  { %v45_v14 = vsel %vm33_vm0, %v42_v9, 0.0  ;;  %v89_v40 = vunpack.c.l.s4 %v193_v39  ;;  %p166_p5 = scmp.ne.s32.totalorder %s122_s22, %s165_s2  ;;  %p171_p7 = scmp.lt.s32.totalorder %s165_s2, %s165_s2 }
  0x14   :  { %37 = vadd.xlane.f32.xlu0 %v36_v12  ;;  %v46_v16 = vadd.f32 %v45_v14, %v44_v10  ;;  %v66_v18 = vsel %vm33_vm0, %v63_v13, 0.0 }
  0x15   :  { %v67_v19 = vadd.f32 %v66_v18, %v65_v15  ;;  %v90_v42 = vunpack.c.0.s8 %v89_v40  ;;  %p172_p8 = por %p171_p7, %p170_p6 }
  0x16   :  { %47 = vadd.xlane.f32.xlu1 %v46_v16 }
  0x17   :  { %v93_v44 = vsub.s32 %v90_v42, %v92_v43  ;;  %p173_p9 = pnand %p172_p8, %p166_p5 }
  0x18   :  { %58 = vadd.xlane.f32.xlu0 %v57_v17 }
  0x1a   :  { %68 = vadd.xlane.f32.xlu1 %v67_v19 }
  0x9d   :  { %v38_v21 = vpop.xlane.xlu0 %37 }
  0x9f   :  { %v48_v22 = vpop.xlane.xlu1 %47 }
  0xa1   :  { %v59_v23 = vpop.xlane.xlu0 %58 }
  0xa2   :  { %v60_v24 = vadd.f32 %v59_v23, %v38_v21 }
  0xa3   :  { %v69_v25 = vpop.xlane.xlu1 %68 }
  0xa4   :  { %v72_v26 = vmul.f32 0.001953125, %v60_v24  ;;  %v70_v27 = vadd.f32 %v69_v25, %v48_v22 }
  0xa6   :  { %v74_v28 = vmul.f32 %v72_v26, %v72_v26  ;;  %v73_v29 = vmul.f32 0.001953125, %v70_v27 }
  0xa8   :  { %v75_v30 = vsub.f32 %v73_v29, %v74_v28 }
  0xaa   :  { %v76_v31 = vmax.f32 %v75_v30, 0.0 }
  0xac   :  { %v77_v32 = vadd.f32 1e-05, %v76_v31 }
  0xae   :  { %143 = vrsqrt.f32 %v77_v32 }
  0xbb   :  { %v144_v34 = vpop.eup %143 }
  0xbc   :  { %v80_v35 = vmul.f32 %v144_v34, %v79_v33 }
  0xbe   :  { %86 = vperm.xlu0 %139, %v80_v35   ;;  %v82_v37 = vmul.f32 %v80_v35, %v72_v26 }
  0xc0   :  { %v83_v38 = vsub.f32 %v81_v36, %v82_v37 }
  0xc2   :  { %99 = vperm.xlu1 %140, %v83_v38  }
 0x139   :  { %v87_v45 = vpop.permute.xlu0 %86 }
 0x13a   :  { %v94_v46 = vrot.slane %v87_v45, %v93_v44 }
 0x13c   :  { %v96_v48 = vmul.f32 %v94_v46, %v29_v0  ;;  %v112_v49 = vmul.f32 %v94_v46, %v51_v1 }
 0x13d   :  { %v100_v47 = vpop.permute.xlu1 %99 }
 0x13e   :  { %v107_v50 = vrot.slane %v100_v47, %v93_v44 }
 0x140   :  { %v109_v51 = vadd.f32 %v107_v50, %v96_v48  ;;  %v113_v52 = vadd.f32 %v112_v49, %v107_v50 }
 0x142   :  { %110 = vst [vmem:[#allocation5] sm:$0xff] %v109_v51  ;;  %115 = vst [vmem:[#allocation5 + $0x8] sm:$0xff] %v113_v52 }
 0x143   :  { %176 = shalt.err (!%p173_p9)
}
 0x144   :  { %127 = dma.vmem_to_hbm [thread:$0]  %s122_s22, 256, %s244_s3, [#allocation4], %s190_s15, %s190_s15, %s191_s16  }
 0x145   :  { %187 = dma.done.wait [#allocation4], 256  }
 0x146   :  { %188 = vsyncadd [#allocation4], 4294967040 }
 0x147   :  { %131 = vsyncpa [#allocation3], 1 }
 0x148   :  { %132 = vsyncpa [#allocation4], 1 }

</bundles_post_ra>
